<compile_context>
chip_gen: v5e
topology: v5e:2x2
jax: 0.10.0
libtpu: 0.0.40
codegen_flags: <defaults>
</compile_context>

<pallas_src>
import functools

import jax
import jax.numpy as jnp
from jax import lax
from jax.experimental import pallas as pl
from jax.experimental.pallas import tpu as pltpu


def _round_up(x, m):
    return (x + m - 1) // m * m


def _ln3d_kernel(x_ref, w_ref, b_ref, o_ref, *, eps: float):
    x = x_ref[...].astype(jnp.float32)                  # (Nb, C, tile)
    # Single-pass channel statistics: one cross-sublane reduce pair per block.
    u = jnp.mean(x, axis=1, keepdims=True)              # (Nb, 1, tile)
    sq = jnp.mean(x * x, axis=1, keepdims=True)         # (Nb, 1, tile)
    var = jnp.maximum(sq - u * u, 0.0)                  # clamp cancellation (free VPU op)
    inv = lax.rsqrt(var + eps)                          # EUP slot (free vs. VPU divide+sqrt)
    w = w_ref[...].astype(jnp.float32)[None]            # (1, C, 1)
    b = b_ref[...].astype(jnp.float32)[None]            # (1, C, 1)
    o_ref[...] = (w * (x - u) * inv + b).astype(o_ref.dtype)


def _vmem_plan():
    """Per-chip VMEM capacity -> (tiling budget bytes, vmem_limit_bytes)."""
    cap = 64 * 1024 * 1024  # conservative default (v7x-sized) if query unavailable
    try:
        cap = int(pltpu.get_tpu_info().vmem_capacity_bytes)
    except Exception:
        pass
    # 64 MiB parts (v7x): limit 48 MiB, budget 32 MiB.  128 MiB parts (v5e/v6e): 64 / 40 MiB.
    vmem_limit = min(64 * 1024 * 1024, cap * 3 // 4)
    budget = min(40 * 1024 * 1024, cap // 2)
    return budget, vmem_limit


def _plan_blocks(N, C, S, dtype_bytes, budget_bytes, max_cols):
    """Pick (batch-fold Nb, spatial tile).  Footprint per step is kept under budget_bytes."""
    # Sublane padding of the channel axis in VMEM/vregs (8 rows for f32, 16 for bf16, ...).
    c_pad = _round_up(C, max(8, 32 // dtype_bytes))
    # Double-buffered in + out (input dtype) plus the in-kernel f32 working copy.
    bytes_per_col = c_pad * (4 * dtype_bytes + 4)
    max_cols = min(max_cols, max(128, budget_bytes // bytes_per_col))
    s_lanes = _round_up(S, 128)

    if s_lanes <= max_cols:
        # Whole spatial extent fits in one tile (typical MaskDecoder3D feature maps):
        # fold batch rows into the block to fatten each grid step's DMA.
        tile = S                                        # == full array dim, no 128-alignment needed
        nb = max(1, min(N, max_cols // s_lanes))
        # Megacore: split along N only if each half still moves >= ~1 MiB of in+out payload.
        if nb == N and N >= 2:
            half = (nb + 1) // 2
            if 2 * half * C * s_lanes * dtype_bytes >= (1 << 20):
                nb = half
        return nb, tile

    # Large spatial extent: one batch row per block, lane tile as big as budget allows.
    cap = max(128, max_cols // 128 * 128)
    tile = cap
    if S % 128 == 0:
        # Prefer an exact divisor (>= 1024 lanes) so every store is unmasked; otherwise keep
        # the largest tile <= cap and let Pallas mask only the ragged last block.
        t = cap
        while t >= 1024 and S % t != 0:
            t -= 128
        if t >= 1024 and S % t == 0:
            tile = t
    return 1, tile


def layernorm3d(x, weight, bias, *, eps: float = 1e-6, max_cols: int = 1 << 17):
    """x: (N, C, D, H, W); weight/bias: (C,). Returns same shape/dtype as x."""
    N, C, D, H, W = x.shape
    S = D * H * W
    dtype_bytes = jnp.dtype(x.dtype).itemsize

    budget, vmem_limit = _vmem_plan()
    nb, tile = _plan_blocks(N, C, S, dtype_bytes, budget, max_cols)

    xf = x.reshape(N, C, S)
    w2 = weight.reshape(C, 1)
    b2 = bias.reshape(C, 1)

    grid = (pl.cdiv(N, nb), pl.cdiv(S, tile))

    # Advisory cost hint: this op is pure HBM bandwidth.
    cost = pl.CostEstimate(
        flops=8 * N * C * S,
        transcendentals=N * S,
        bytes_accessed=2 * N * C * S * dtype_bytes + 2 * C * dtype_bytes,
    )

    out = pl.pallas_call(
        functools.partial(_ln3d_kernel, eps=eps),
        out_shape=jax.ShapeDtypeStruct((N, C, S), x.dtype),
        grid=grid,
        in_specs=[
            pl.BlockSpec((nb, C, tile), lambda n, s: (n, 0, s)),
            pl.BlockSpec((C, 1), lambda n, s: (0, 0)),
            pl.BlockSpec((C, 1), lambda n, s: (0, 0)),
        ],
        out_specs=pl.BlockSpec((nb, C, tile), lambda n, s: (n, 0, s)),
        compiler_params=pltpu.CompilerParams(
            dimension_semantics=("parallel", "parallel"),
            vmem_limit_bytes=vmem_limit,
        ),
        cost_estimate=cost,
    )(xf, w2, b2)

    return out.reshape(N, C, D, H, W)


def layernorm3d_ref(x, weight, bias, eps=1e-6):
    xf = x.astype(jnp.float32)
    u = xf.mean(axis=1, keepdims=True)
    s = ((xf - u) ** 2).mean(axis=1, keepdims=True)
    y = (xf - u) / jnp.sqrt(s + eps)
    y = weight[None, :, None, None, None] * y + bias[None, :, None, None, None]
    return y.astype(x.dtype)


if __name__ == "__main__":
    key = jax.random.PRNGKey(0)
    kx, kw, kb, kx2 = jax.random.split(key, 4)

    # Small shapes consistent with LayerNorm3d usage in MaskDecoder3D: (N, C, D, H, W)
    N, C, D, H, W = 2, 4, 8, 8, 8
    x = jax.random.normal(kx, (N, C, D, H, W), dtype=jnp.float32)

    # Module __init__ uses ones/zeros; perturb deterministically to exercise affine path.
    weight = jnp.ones((C,), jnp.float32) + 0.1 * jax.random.normal(kw, (C,), jnp.float32)
    bias = jnp.zeros((C,), jnp.float32) + 0.1 * jax.random.normal(kb, (C,), jnp.float32)

    # 1) Small-S path: whole spatial extent in one tile, batch rows folded into the block.
    out = jax.block_until_ready(layernorm3d(x, weight, bias, eps=1e-6))
    ref = layernorm3d_ref(x, weight, bias, eps=1e-6)
    assert out.shape == x.shape and out.dtype == x.dtype
    assert jnp.allclose(out, ref, atol=1e-4, rtol=1e-4), "mismatch (single-tile path)"

    # 2) Non-128-divisible spatial extent (no padding round-trip; full-dim tile).
    D2, H2, W2 = 5, 6, 7
    x2 = jax.random.normal(kx2, (N, C, D2, H2, W2), dtype=jnp.float32)
    out2 = jax.block_until_ready(layernorm3d(x2, weight, bias, eps=1e-6))
    ref2 = layernorm3d_ref(x2, weight, bias, eps=1e-6)
    assert out2.shape == x2.shape and out2.dtype == x2.dtype
    assert jnp.allclose(out2, ref2, atol=1e-4, rtol=1e-4), "mismatch (ragged full-dim tile)"

    # 3) Force the large-S tiled path (multiple lane tiles per batch row).
    out3 = jax.block_until_ready(layernorm3d(x, weight, bias, eps=1e-6, max_cols=256))
    assert jnp.allclose(out3, ref, atol=1e-4, rtol=1e-4), "mismatch (tiled path)"

    # 4) Force the tiled path with a ragged (masked) last lane block.
    out4 = jax.block_until_ready(layernorm3d(x2, weight, bias, eps=1e-6, max_cols=128))
    assert jnp.allclose(out4, ref2, atol=1e-4, rtol=1e-4), "mismatch (masked last block)"

    print("KERNEL_OK")
</pallas_src>

<mosaic_0001>
module attributes {stable_mosaic.version = 11 : i64} {
  func.func @_ln3d_kernel(%arg0: i32, %arg1: i32, %arg2: memref<2x4x512xf32, #tpu.memory_space<vmem>>, %arg3: memref<4x1xf32, #tpu.memory_space<vmem>>, %arg4: memref<4x1xf32, #tpu.memory_space<vmem>>, %arg5: memref<2x4x512xf32, #tpu.memory_space<vmem>>) attributes {dimension_semantics = [#tpu.dimension_semantics<parallel>, #tpu.dimension_semantics<parallel>], iteration_bounds = array<i64: 1, 1>, scalar_prefetch = 0 : i64, scratch_operands = 0 : i64, tpu.core_type = #tpu.core_type<tc>, window_params = [{transform_indices = @transform_0, window_bounds = array<i64: 2, 4, 512>}, {pipeline_mode = #tpu.pipeline_mode<synchronous>, transform_indices = @transform_1, window_bounds = array<i64: 4, 1>}, {pipeline_mode = #tpu.pipeline_mode<synchronous>, transform_indices = @transform_2, window_bounds = array<i64: 4, 1>}, {transform_indices = @transform_3, window_bounds = array<i64: 2, 4, 512>}]} {
    %c0 = arith.constant 0 : index
    %c0_0 = arith.constant 0 : index
    %c0_1 = arith.constant 0 : index
    %0 = vector.load %arg2[%c0, %c0_0, %c0_1] : memref<2x4x512xf32, #tpu.memory_space<vmem>>, vector<2x4x512xf32>
    %cst = arith.constant dense<0.000000e+00> : vector<2x512xf32>
    %1 = vector.multi_reduction <add>, %0, %cst [1] : vector<2x4x512xf32> to vector<2x512xf32>
    %2 = vector.shape_cast %1 : vector<2x512xf32> to vector<2x1x512xf32>
    %cst_2 = arith.constant 4.000000e+00 : f32
    %3 = vector.broadcast %cst_2 : f32 to vector<2x1x512xf32>
    %4 = arith.divf %2, %3 : vector<2x1x512xf32>
    %5 = arith.mulf %0, %0 : vector<2x4x512xf32>
    %cst_3 = arith.constant dense<0.000000e+00> : vector<2x512xf32>
    %6 = vector.multi_reduction <add>, %5, %cst_3 [1] : vector<2x4x512xf32> to vector<2x512xf32>
    %7 = vector.shape_cast %6 : vector<2x512xf32> to vector<2x1x512xf32>
    %cst_4 = arith.constant 4.000000e+00 : f32
    %8 = vector.broadcast %cst_4 : f32 to vector<2x1x512xf32>
    %9 = arith.divf %7, %8 : vector<2x1x512xf32>
    %10 = arith.mulf %4, %4 : vector<2x1x512xf32>
    %11 = arith.subf %9, %10 : vector<2x1x512xf32>
    %cst_5 = arith.constant 0.000000e+00 : f32
    %12 = vector.broadcast %cst_5 : f32 to vector<2x1x512xf32>
    %13 = arith.maximumf %11, %12 : vector<2x1x512xf32>
    %cst_6 = arith.constant 9.99999997E-7 : f32
    %14 = vector.broadcast %cst_6 : f32 to vector<2x1x512xf32>
    %15 = arith.addf %13, %14 : vector<2x1x512xf32>
    %16 = math.rsqrt %15 : vector<2x1x512xf32>
    %c0_7 = arith.constant 0 : index
    %c0_8 = arith.constant 0 : index
    %17 = vector.load %arg3[%c0_7, %c0_8] : memref<4x1xf32, #tpu.memory_space<vmem>>, vector<4x1xf32>
    %18 = vector.shape_cast %17 : vector<4x1xf32> to vector<1x4x1xf32>
    %c0_9 = arith.constant 0 : index
    %c0_10 = arith.constant 0 : index
    %19 = vector.load %arg4[%c0_9, %c0_10] : memref<4x1xf32, #tpu.memory_space<vmem>>, vector<4x1xf32>
    %20 = vector.shape_cast %19 : vector<4x1xf32> to vector<1x4x1xf32>
    %21 = vector.broadcast %4 : vector<2x1x512xf32> to vector<2x4x512xf32>
    %22 = arith.subf %0, %21 : vector<2x4x512xf32>
    %23 = vector.broadcast %18 : vector<1x4x1xf32> to vector<2x4x512xf32>
    %24 = arith.mulf %23, %22 : vector<2x4x512xf32>
    %25 = vector.broadcast %16 : vector<2x1x512xf32> to vector<2x4x512xf32>
    %26 = arith.mulf %24, %25 : vector<2x4x512xf32>
    %27 = vector.broadcast %20 : vector<1x4x1xf32> to vector<2x4x512xf32>
    %28 = arith.addf %26, %27 : vector<2x4x512xf32>
    %c0_11 = arith.constant 0 : index
    %c0_12 = arith.constant 0 : index
    %c0_13 = arith.constant 0 : index
    %29 = vector.load %arg5[%c0_11, %c0_12, %c0_13] : memref<2x4x512xf32, #tpu.memory_space<vmem>>, vector<2x4x512xf32>
    tpu.vector_store %arg5[%c0_11, %c0_12, %c0_13], %28 {strides = array<i32>} : memref<2x4x512xf32, #tpu.memory_space<vmem>>, vector<2x4x512xf32>,
    return
  }
  func.func @transform_0(%arg0: i32, %arg1: i32) -> (i32, i32, i32) {
    %c0_i32 = arith.constant 0 : i32
    %c0_i32_0 = arith.constant 0 : i32
    return %arg0, %c0_i32, %arg1 : i32, i32, i32
  }
  func.func @transform_1(%arg0: i32, %arg1: i32) -> (i32, i32) {
    %c0_i32 = arith.constant 0 : i32
    %c0_i32_0 = arith.constant 0 : i32
    %c0_i32_1 = arith.constant 0 : i32
    return %c0_i32, %c0_i32_0 : i32, i32
  }
  func.func @transform_2(%arg0: i32, %arg1: i32) -> (i32, i32) {
    %c0_i32 = arith.constant 0 : i32
    %c0_i32_0 = arith.constant 0 : i32
    %c0_i32_1 = arith.constant 0 : i32
    return %c0_i32, %c0_i32_0 : i32, i32
  }
  func.func @transform_3(%arg0: i32, %arg1: i32) -> (i32, i32, i32) {
    %c0_i32 = arith.constant 0 : i32
    %c0_i32_0 = arith.constant 0 : i32
    return %arg0, %c0_i32, %arg1 : i32, i32, i32
  }
}

</mosaic_0001>

<bundles_post_ra>
// kernel: tpu_custom_call.1
= control target key start
LH: loop header
LB: loop body
LE: loop exit
PB: predicated region body
PF: predicated region fallthrough
CT: control target
= control target key end

     0   :  { %8 = vsyncpa [#allocation3], 0  ;;  %s857_s0 = inlined_call_operand.hbm [shape: f32[2,4,512], index: 0, kind: input, shape index: {}]   ;;  %s858_s1 = inlined_call_operand.vmem [shape: f32[4,1], index: 1, kind: input, shape index: {}]   ;;  %s859_s2 = inlined_call_operand.vmem [shape: f32[4,1], index: 2, kind: input, shape index: {}]   ;;  %s860_s3 = inlined_call_operand.hbm [shape: f32[2,4,512], index: 3, kind: output, shape index: {}]  }
   0x1   :  { %9 = vsyncpa [#allocation4], 0  ;;  %s14_s14 = sshll.u32 %s857_s0, 4  ;;  %s548_s15 = smov [#allocation2]   ;;  %s15_s14 = int_to_ptr.hbm [resolvable:$true] %s14_s14 }
   0x2   :  { %s16_s16 = sshll.u32 %s548_s15, 4  ;;  %s549_s17 = smov 256   ;;  %s17_s16 = int_to_ptr.vmem [resolvable:$true] %s16_s16 }
   0x3   :  { %s550_s18 = smov 16  }
   0x4   :  { %22 = dma.hbm_to_vmem [thread:$0]  %s15_s14, 512, %s17_s16, [#allocation3], %s549_s17, %s549_s17, %s550_s18  }
   0x5   :  { %544 = dma.done.wait [#allocation3], 512  }
   0x6   :  { %545 = vsyncadd [#allocation3], 4294966784  ;;  %v551_v0 = vmov 0   ;;  %v341_v1 = vld [vmem:[%s858_s1] sm:$0xf]  ;;  %v586_v3 = vld [vmem:[#allocation2] sm:$0xff] }
   0x7   :  { %477 = vset.pattern.permute.xlu0 %v551_v0  ;;  %v342_v2 = vld [vmem:[%s859_s2] sm:$0xf]  ;;  %v588_v4 = vld [vmem:[#allocation2 + $0x8] sm:$0xff]  ;;  %v590_v5 = vld [vmem:[#allocation2 + $0x10] sm:$0xff]  ;;  %39 = vst [vmem:[#allocation1] ss:$2 sm:$0xff] %v586_v3  ;;  %v134_v7 = vmul.f32 %v586_v3, %v586_v3 }
   0x8   :  { %369 = vperm.xlu0 %477, %v341_v1   ;;  %v592_v6 = vld [vmem:[#allocation2 + $0x18] sm:$0xff]  ;;  %41 = vst [vmem:[#allocation1 + $0x10] ss:$2 sm:$0xff] %v588_v4  ;;  %v135_v10 = vmul.f32 %v588_v4, %v588_v4  ;;  %v136_v13 = vmul.f32 %v590_v5, %v590_v5  ;;  %v552_v18 = vmov 4.0   ;;  %vm62_vm0 = vcmask 1043456   ;;  %s553_s1 = smov [#allocation5]  }
   0x9   :  { %47 = vst [vmem:[#allocation1 + $0x20] ss:$2 sm:$0xff] %v590_v5  ;;  %v137_v16 = vmul.f32 %v592_v6, %v592_v6  ;;  %478 = vrcp.f32 %v552_v18  ;;  %s456_s2 = sshll.u32 %s553_s1, 4  ;;  %s458_s24 = sshll.u32 %s860_s3, 4  ;;  %s457_s2 = int_to_ptr.vmem [resolvable:$true] %s456_s2  ;;  %s459_s24 = int_to_ptr.hbm [resolvable:$true] %s458_s24 }
   0xa   :  { %49 = vst [vmem:[#allocation1 + $0x30] ss:$2 sm:$0xff] %v592_v6 }
   0xe   :  { %v42_v8 = vld.sshfl [vmem:[#allocation1] sm:$0xff pattern:$0x75316420]  ;;  %v43_v9 = vld.sshfl [vmem:[#allocation1 + $0x8] sm:$0xff pattern:$0x75316420] }
   0xf   :  { %v44_v11 = vld.sshfl [vmem:[#allocation1 + $0x10] sm:$0xff pattern:$0x75316420]  ;;  %v45_v12 = vld.sshfl [vmem:[#allocation1 + $0x18] sm:$0xff pattern:$0x75316420]  ;;  %v479_v32 = vpop.eup %478 }
  0x10   :  { %417 = vperm.xlu0 %477, %v342_v2   ;;  %v50_v14 = vld.sshfl [vmem:[#allocation1 + $0x20] sm:$0xff pattern:$0x75316420]  ;;  %v51_v15 = vld.sshfl [vmem:[#allocation1 + $0x28] sm:$0xff pattern:$0x75316420]  ;;  %vm124_vm1 = vweird.f32 %v479_v32 }
  0x11   :  { %v52_v17 = vld.sshfl [vmem:[#allocation1 + $0x30] sm:$0xff pattern:$0x75316420]  ;;  %142 = vst [vmem:[#allocation1] ss:$2 sm:$0xff] %v134_v7  ;;  %v63_v20 = vsel %vm62_vm0, %v42_v8, 0.0 }
  0x12   :  { %v53_v19 = vld.sshfl [vmem:[#allocation1 + $0x38] sm:$0xff pattern:$0x75316420]  ;;  %144 = vst [vmem:[#allocation1 + $0x10] ss:$2 sm:$0xff] %v135_v10  ;;  %v70_v21 = vsel %vm62_vm0, %v43_v9, 0.0 }
  0x13   :  { %150 = vst [vmem:[#allocation1 + $0x20] ss:$2 sm:$0xff] %v136_v13  ;;  %v77_v22 = vsel %vm62_vm0, %v44_v11, 0.0  ;;  %v84_v23 = vsel %vm62_vm0, %v45_v12, 0.0  ;;  %v64_v24 = vrot.slane %v63_v20, 4  ;;  %v71_v25 = vrot.slane %v70_v21, 4 }
  0x14   :  { %152 = vst [vmem:[#allocation1 + $0x30] ss:$2 sm:$0xff] %v137_v16  ;;  %v78_v26 = vrot.slane %v77_v22, 4  ;;  %v85_v27 = vrot.slane %v84_v23, 4  ;;  %v91_v28 = vsel %vm62_vm0, %v50_v14, 0.0  ;;  %v98_v29 = vsel %vm62_vm0, %v51_v15, 0.0 }
  0x15   :  { %v105_v30 = vsel %vm62_vm0, %v52_v17, 0.0  ;;  %v112_v31 = vsel %vm62_vm0, %v53_v19, 0.0  ;;  %v65_v33 = vadd.f32 %v64_v24, %v63_v20  ;;  %v72_v34 = vadd.f32 %v71_v25, %v70_v21 }
  0x16   :  { %v79_v35 = vadd.f32 %v78_v26, %v77_v22  ;;  %v86_v36 = vadd.f32 %v85_v27, %v84_v23  ;;  %v120_v37 = vmul.f32 4.0, %v479_v32  ;;  %v92_v38 = vrot.slane %v91_v28, 4 }
  0x17   :  { %v99_v39 = vrot.slane %v98_v29, 4  ;;  %v106_v40 = vrot.slane %v105_v30, 4  ;;  %v66_v41 = vrot.slane %v65_v33, 2  ;;  %v73_v42 = vrot.slane %v72_v34, 2 }
  0x18   :  { %v80_v43 = vrot.slane %v79_v35, 2  ;;  %v87_v44 = vrot.slane %v86_v36, 2  ;;  %v121_v45 = vsub.f32 1.0, %v120_v37  ;;  %v93_v46 = vadd.f32 %v92_v38, %v91_v28  ;;  %v145_v8 = vld.sshfl [vmem:[#allocation1] sm:$0xff pattern:$0x75316420] }
  0x19   :  { %v100_v47 = vadd.f32 %v99_v39, %v98_v29  ;;  %v107_v48 = vadd.f32 %v106_v40, %v105_v30  ;;  %v67_v49 = vadd.f32 %v66_v41, %v65_v33  ;;  %v74_v50 = vadd.f32 %v73_v42, %v72_v34  ;;  %v146_v13 = vld.sshfl [vmem:[#allocation1 + $0x8] sm:$0xff pattern:$0x75316420]  ;;  %v147_v17 = vld.sshfl [vmem:[#allocation1 + $0x10] sm:$0xff pattern:$0x75316420] }
  0x1a   :  { %v81_v51 = vadd.f32 %v80_v43, %v79_v35  ;;  %v88_v52 = vadd.f32 %v87_v44, %v86_v36  ;;  %v122_v53 = vmul.f32 %v479_v32, %v121_v45  ;;  %v94_v54 = vrot.slane %v93_v46, 2  ;;  %v148_v22 = vld.sshfl [vmem:[#allocation1 + $0x18] sm:$0xff pattern:$0x75316420] }
  0x1b   :  { %v101_v55 = vrot.slane %v100_v47, 2  ;;  %v108_v56 = vrot.slane %v107_v48, 2  ;;  %v68_v57 = vrot.slane %v67_v49, 1  ;;  %v75_v58 = vrot.slane %v74_v50, 1 }
  0x1c   :  { %v82_v59 = vrot.slane %v81_v51, 1  ;;  %v89_v60 = vrot.slane %v88_v52, 1  ;;  %v123_v61 = vadd.f32 %v479_v32, %v122_v53  ;;  %v95_v62 = vadd.f32 %v94_v54, %v93_v46  ;;  %v153_v23 = vld.sshfl [vmem:[#allocation1 + $0x20] sm:$0xff pattern:$0x75316420] }
  0x1d   :  { %v102_v63 = vadd.f32 %v101_v55, %v100_v47  ;;  %v109_v0 = vadd.f32 %v108_v56, %v107_v48  ;;  %v69_v1 = vadd.f32 %v68_v57, %v67_v49  ;;  %v76_v2 = vadd.f32 %v75_v58, %v74_v50  ;;  %v154_v26 = vld.sshfl [vmem:[#allocation1 + $0x28] sm:$0xff pattern:$0x75316420] }
  0x1e   :  { %v83_v7 = vadd.f32 %v82_v59, %v81_v51  ;;  %v614_v9 = vsel %vm124_vm1, %v479_v32, %v123_v61  ;;  %v90_v10 = vadd.f32 %v89_v60, %v88_v52  ;;  %v96_v11 = vrot.slane %v95_v62, 1  ;;  %v155_v32 = vld.sshfl [vmem:[#allocation1 + $0x30] sm:$0xff pattern:$0x75316420] }
  0x1f   :  { %v103_v12 = vrot.slane %v102_v63, 1  ;;  %v110_v14 = vrot.slane %v109_v0, 1  ;;  %v113_v15 = vrot.slane %v112_v31, 4  ;;  %v617_v16 = vmul.f32 %v614_v9, %v69_v1 }
  0x20   :  { %v97_v18 = vadd.f32 %v96_v11, %v95_v62  ;;  %v620_v20 = vmul.f32 %v614_v9, %v76_v2  ;;  %v623_v21 = vmul.f32 %v614_v9, %v83_v7  ;;  %v626_v25 = vmul.f32 %v614_v9, %v90_v10  ;;  %v156_v62 = vld.sshfl [vmem:[#allocation1 + $0x38] sm:$0xff pattern:$0x75316420] }
  0x21   :  { %v104_v19 = vadd.f32 %v103_v12, %v102_v63  ;;  %v114_v24 = vadd.f32 %v113_v15, %v112_v31  ;;  %v165_v27 = vsel %vm62_vm0, %v145_v8, 0.0  ;;  %v172_v28 = vsel %vm62_vm0, %v146_v13, 0.0 }
  0x22   :  { %v111_v29 = vadd.f32 %v110_v14, %v109_v0  ;;  %v631_v30 = vmul.f32 %v614_v9, %v97_v18  ;;  %v166_v33 = vrot.slane %v165_v27, 4  ;;  %v173_v34 = vrot.slane %v172_v28, 4 }
  0x23   :  { %v115_v35 = vrot.slane %v114_v24, 2  ;;  %v634_v36 = vmul.f32 %v614_v9, %v104_v19  ;;  %v179_v31 = vsel %vm62_vm0, %v147_v17, 0.0  ;;  %v186_v37 = vsel %vm62_vm0, %v148_v22, 0.0 }
  0x24   :  { %v167_v38 = vadd.f32 %v166_v33, %v165_v27  ;;  %v174_v39 = vadd.f32 %v173_v34, %v172_v28  ;;  %v180_v40 = vrot.slane %v179_v31, 4  ;;  %v187_v41 = vrot.slane %v186_v37, 4 }
  0x25   :  { %v116_v42 = vadd.f32 %v115_v35, %v114_v24  ;;  %v193_v43 = vsel %vm62_vm0, %v153_v23, 0.0  ;;  %v200_v44 = vsel %vm62_vm0, %v154_v26, 0.0  ;;  %v207_v45 = vsel %vm62_vm0, %v155_v32, 0.0 }
  0x26   :  { %v168_v46 = vrot.slane %v167_v38, 2  ;;  %v175_v47 = vrot.slane %v174_v39, 2  ;;  %v181_v48 = vadd.f32 %v180_v40, %v179_v31  ;;  %v188_v49 = vadd.f32 %v187_v41, %v186_v37 }
  0x27   :  { %v117_v50 = vrot.slane %v116_v42, 1  ;;  %v194_v51 = vrot.slane %v193_v43, 4  ;;  %v201_v52 = vrot.slane %v200_v44, 4  ;;  %v208_v53 = vrot.slane %v207_v45, 4 }
  0x28   :  { %v169_v54 = vadd.f32 %v168_v46, %v167_v38  ;;  %v176_v55 = vadd.f32 %v175_v47, %v174_v39  ;;  %v182_v56 = vrot.slane %v181_v48, 2  ;;  %v189_v57 = vrot.slane %v188_v49, 2 }
  0x29   :  { %v642_v58 = vmul.f32 %v614_v9, %v111_v29  ;;  %v195_v59 = vadd.f32 %v194_v51, %v193_v43  ;;  %v202_v60 = vadd.f32 %v201_v52, %v200_v44  ;;  %v209_v61 = vadd.f32 %v208_v53, %v207_v45 }
  0x2a   :  { %v170_v63 = vrot.slane %v169_v54, 1  ;;  %v177_v0 = vrot.slane %v176_v55, 1  ;;  %v183_v1 = vadd.f32 %v182_v56, %v181_v48  ;;  %v190_v2 = vadd.f32 %v189_v57, %v188_v49 }
  0x2b   :  { %v118_v7 = vadd.f32 %v117_v50, %v116_v42  ;;  %v196_v8 = vrot.slane %v195_v59, 2  ;;  %v203_v10 = vrot.slane %v202_v60, 2  ;;  %v210_v11 = vrot.slane %v209_v61, 2 }
  0x2c   :  { %v171_v12 = vadd.f32 %v170_v63, %v169_v54  ;;  %v178_v13 = vadd.f32 %v177_v0, %v176_v55  ;;  %v184_v14 = vrot.slane %v183_v1, 1  ;;  %v191_v15 = vrot.slane %v190_v2, 1 }
  0x2d   :  { %v197_v17 = vadd.f32 %v196_v8, %v195_v59  ;;  %v204_v18 = vadd.f32 %v203_v10, %v202_v60  ;;  %v211_v19 = vadd.f32 %v210_v11, %v209_v61  ;;  %v214_v22 = vsel %vm62_vm0, %v156_v62, 0.0 }
  0x2e   :  { %v185_v23 = vadd.f32 %v184_v14, %v183_v1  ;;  %v192_v24 = vadd.f32 %v191_v15, %v190_v2  ;;  %v215_v26 = vrot.slane %v214_v22, 4  ;;  %v221_v27 = vmul.f32 %v171_v12, %v614_v9 }
  0x2f   :  { %v198_v28 = vrot.slane %v197_v17, 1  ;;  %v205_v29 = vrot.slane %v204_v18, 1  ;;  %v212_v32 = vrot.slane %v211_v19, 1  ;;  %v222_v33 = vmul.f32 %v178_v13, %v614_v9 }
  0x30   :  { %v216_v34 = vadd.f32 %v215_v26, %v214_v22  ;;  %v223_v35 = vmul.f32 %v185_v23, %v614_v9  ;;  %v224_v31 = vmul.f32 %v192_v24, %v614_v9  ;;  %v229_v37 = vmul.f32 %v617_v16, %v617_v16 }
  0x31   :  { %v199_v38 = vadd.f32 %v198_v28, %v197_v17  ;;  %v206_v39 = vadd.f32 %v205_v29, %v204_v18  ;;  %v213_v40 = vadd.f32 %v212_v32, %v211_v19  ;;  %v230_v41 = vmul.f32 %v620_v20, %v620_v20 }
  0x32   :  { %v217_v42 = vrot.slane %v216_v34, 2  ;;  %v231_v43 = vmul.f32 %v623_v21, %v623_v21  ;;  %v232_v44 = vmul.f32 %v626_v25, %v626_v25  ;;  %v233_v45 = vmul.f32 %v631_v30, %v631_v30 }
  0x33   :  { %v225_v46 = vmul.f32 %v199_v38, %v614_v9  ;;  %v226_v47 = vmul.f32 %v206_v39, %v614_v9  ;;  %v227_v48 = vmul.f32 %v213_v40, %v614_v9  ;;  %v234_v49 = vmul.f32 %v634_v36, %v634_v36 }
  0x34   :  { %v133_v50 = vmul.f32 %v614_v9, %v118_v7  ;;  %v218_v51 = vadd.f32 %v217_v42, %v216_v34  ;;  %v235_v52 = vmul.f32 %v642_v58, %v642_v58  ;;  %v237_v53 = vsub.f32 %v221_v27, %v229_v37 }
  0x35   :  { %v238_v54 = vsub.f32 %v222_v33, %v230_v41  ;;  %v239_v55 = vsub.f32 %v223_v35, %v231_v43  ;;  %v240_v56 = vsub.f32 %v224_v31, %v232_v44  ;;  %v241_v57 = vsub.f32 %v225_v46, %v233_v45 }
  0x36   :  { %v219_v59 = vrot.slane %v218_v51, 1  ;;  %v242_v60 = vsub.f32 %v226_v47, %v234_v49  ;;  %v243_v61 = vsub.f32 %v227_v48, %v235_v52  ;;  %v245_v62 = vmax.f32 %v237_v53, 0.0 }
  0x37   :  { %v246_v63 = vmax.f32 %v238_v54, 0.0  ;;  %v247_v0 = vmax.f32 %v239_v55, 0.0  ;;  %v248_v1 = vmax.f32 %v240_v56, 0.0  ;;  %v249_v2 = vmax.f32 %v241_v57, 0.0 }
  0x38   :  { %v220_v8 = vadd.f32 %v219_v59, %v218_v51  ;;  %v236_v10 = vmul.f32 %v133_v50, %v133_v50  ;;  %v250_v7 = vmax.f32 %v242_v60, 0.0  ;;  %v667_v11 = vadd.f32 1e-06, %v245_v62 }
  0x39   :  { %v251_v12 = vmax.f32 %v243_v61, 0.0  ;;  %v669_v13 = vadd.f32 1e-06, %v246_v63  ;;  %v671_v14 = vadd.f32 1e-06, %v247_v0  ;;  %v351_v24 = vrot.slane %v620_v20, 4 }
  0x3a   :  { %v228_v15 = vmul.f32 %v220_v8, %v614_v9  ;;  %v674_v17 = vadd.f32 1e-06, %v248_v1  ;;  %v676_v18 = vadd.f32 1e-06, %v249_v2  ;;  %480 = vrsqrt.f32 %v667_v11 }
  0x3b   :  { %v679_v22 = vadd.f32 1e-06, %v250_v7  ;;  %482 = vrsqrt.f32 %v669_v13  ;;  %v682_v23 = vadd.f32 1e-06, %v251_v12  ;;  %v352_v9 = vrot.slane %v626_v25, 4 }
  0x3c   :  { %v244_v19 = vsub.f32 %v228_v15, %v236_v10  ;;  %484 = vrsqrt.f32 %v671_v14  ;;  %v353_v27 = vrot.slane %v634_v36, 4  ;;  %v354_v28 = vrot.slane %v133_v50, 4 }
  0x3d   :  { %486 = vrsqrt.f32 %v674_v17  ;;  %v355_v29 = vsel %vm62_vm0, %v617_v16, %v351_v24  ;;  %v356_v20 = vsel %vm62_vm0, %v623_v21, %v352_v9  ;;  %vm267_vm2 = vweird.f32 %v667_v11 }
  0x3e   :  { %v252_v26 = vmax.f32 %v244_v19, 0.0  ;;  %488 = vrsqrt.f32 %v676_v18  ;;  %v357_v33 = vsel %vm62_vm0, %v631_v30, %v353_v27  ;;  %v358_v25 = vsel %vm62_vm0, %v642_v58, %v354_v28 }
  0x3f   :  { %490 = vrsqrt.f32 %v679_v22  ;;  %v363_v36 = vsub.f32 %v586_v3, %v355_v29  ;;  %v364_v16 = vsub.f32 %v588_v4, %v356_v20  ;;  %v365_v21 = vsub.f32 %v590_v5, %v357_v33 }
  0x40   :  { %v692_v32 = vadd.f32 1e-06, %v252_v26  ;;  %v699_v34 = vpop.eup %480  ;;  %492 = vrsqrt.f32 %v682_v23  ;;  %v366_v30 = vsub.f32 %v592_v6, %v358_v25  ;;  %vm277_vm4 = vweird.f32 %v669_v13 }
  0x41   :  { %v706_v35 = vpop.eup %482  ;;  %376 = vst [vmem:[#allocation1] ss:$2 sm:$0xff] %v363_v36  ;;  %v262_v40 = vmul.f32 %v699_v34, %v667_v11  ;;  %vm268_vm3 = vweird.f32 %v699_v34  ;;  %vm287_vm6 = vweird.f32 %v671_v14  ;;  %vm297_vm9 = vweird.f32 %v674_v17 }
  0x42   :  { %494 = vrsqrt.f32 %v692_v32  ;;  %v709_v31 = vpop.eup %484  ;;  %378 = vst [vmem:[#allocation1 + $0x10] ss:$2 sm:$0xff] %v364_v16  ;;  %v272_v39 = vmul.f32 %v706_v35, %v669_v13  ;;  %vm278_vm5 = vweird.f32 %v706_v35  ;;  %vm753_vm8 = vmor %vm267_vm2, %vm268_vm3  ;;  %vm317_vm12 = vweird.f32 %v679_v22 }
  0x43   :  { %v713_v37 = vpop.eup %486  ;;  %384 = vst [vmem:[#allocation1 + $0x20] ss:$2 sm:$0xff] %v365_v21  ;;  %v282_v41 = vmul.f32 %v709_v31, %v671_v14  ;;  %v263_v49 = vmul.f32 %v699_v34, %v262_v40  ;;  %vm288_vm7 = vweird.f32 %v709_v31  ;;  %vm759_vm11 = vmor %vm277_vm4, %vm278_vm5  ;;  %vm337_vm15 = vweird.f32 %v692_v32 }
  0x44   :  { %v715_v38 = vpop.eup %488  ;;  %386 = vst [vmem:[#allocation1 + $0x30] ss:$2 sm:$0xff] %v366_v30  ;;  %v292_v5 = vmul.f32 %v713_v37, %v674_v17  ;;  %v273_v45 = vmul.f32 %v706_v35, %v272_v39  ;;  %vm298_vm10 = vweird.f32 %v713_v37  ;;  %vm765_vm14 = vmor %vm287_vm6, %vm288_vm7  ;;  %vm307_vm3 = vweird.f32 %v676_v18 }
  0x45   :  { %v717_v3 = vpop.eup %490  ;;  %v302_v42 = vmul.f32 %v715_v38, %v676_v18  ;;  %v283_v50 = vmul.f32 %v709_v31, %v282_v41  ;;  %v264_v57 = vmul.f32 0.5, %v263_v49  ;;  %vm777_vm2 = vmor %vm297_vm9, %vm298_vm10  ;;  %vm308_vm4 = vweird.f32 %v715_v38 }
  0x46   :  { %v719_v4 = vpop.eup %492  ;;  %v312_v6 = vmul.f32 %v717_v3, %v679_v22  ;;  %v293_v46 = vmul.f32 %v713_v37, %v292_v5  ;;  %v274_v53 = vmul.f32 0.5, %v273_v45  ;;  %vm318_vm13 = vweird.f32 %v717_v3  ;;  %vm810_vm10 = vmor %vm307_vm3, %vm308_vm4 }
  0x47   :  { %v322_v43 = vmul.f32 %v719_v4, %v682_v23  ;;  %v303_v51 = vmul.f32 %v715_v38, %v302_v42  ;;  %v284_v59 = vmul.f32 0.5, %v283_v50  ;;  %v265_v8 = vsub.f32 1.5, %v264_v57  ;;  %vm788_vm5 = vmor %vm317_vm12, %vm318_vm13 }
  0x48   :  { %v721_v58 = vpop.eup %494  ;;  %v313_v47 = vmul.f32 %v717_v3, %v312_v6  ;;  %v294_v54 = vmul.f32 0.5, %v293_v46  ;;  %v275_v62 = vsub.f32 1.5, %v274_v53  ;;  %v380_v26 = vld.sshfl [vmem:[#allocation1 + $0x8] sm:$0xff pattern:$0x75316420]  ;;  %vm327_vm6 = vweird.f32 %v682_v23 }
  0x49   :  { %v332_v44 = vmul.f32 %v721_v58, %v692_v32  ;;  %v323_v52 = vmul.f32 %v719_v4, %v322_v43  ;;  %v304_v60 = vmul.f32 0.5, %v303_v51  ;;  %v285_v7 = vsub.f32 1.5, %v284_v59  ;;  %v382_v9 = vld.sshfl [vmem:[#allocation1 + $0x18] sm:$0xff pattern:$0x75316420] }
  0x4a   :  { %v314_v55 = vmul.f32 0.5, %v313_v47  ;;  %v295_v63 = vsub.f32 1.5, %v294_v54  ;;  %vm338_vm1 = vweird.f32 %v721_v58  ;;  %v276_v15 = vmul.f32 %v706_v35, %v275_v62  ;;  %v388_v29 = vld.sshfl [vmem:[#allocation1 + $0x28] sm:$0xff pattern:$0x75316420] }
  0x4b   :  { %v333_v48 = vmul.f32 %v721_v58, %v332_v44  ;;  %v324_v61 = vmul.f32 0.5, %v323_v52  ;;  %v305_v12 = vsub.f32 1.5, %v304_v60  ;;  %vm328_vm7 = vweird.f32 %v719_v4  ;;  %v390_v20 = vld.sshfl [vmem:[#allocation1 + $0x38] sm:$0xff pattern:$0x75316420]  ;;  %vm801_vm9 = vmor %vm337_vm15, %vm338_vm1 }
  0x4c   :  { %v315_v1 = vsub.f32 1.5, %v314_v55  ;;  %v296_v19 = vmul.f32 %v713_v37, %v295_v63  ;;  %v266_v33 = vmul.f32 %v699_v34, %v265_v8  ;;  %v286_v25 = vmul.f32 %v709_v31, %v285_v7  ;;  %v379_v36 = vld.sshfl [vmem:[#allocation1] sm:$0xff pattern:$0x75316420]  ;;  %vm825_vm12 = vmor %vm327_vm6, %vm328_vm7 }
  0x4d   :  { %v334_v56 = vmul.f32 0.5, %v333_v48  ;;  %v325_v13 = vsub.f32 1.5, %v324_v61  ;;  %v381_v16 = vld.sshfl [vmem:[#allocation1 + $0x10] sm:$0xff pattern:$0x75316420]  ;;  %v306_v21 = vmul.f32 %v715_v38, %v305_v12  ;;  %v280_v41 = vsel %vm759_vm11, %v706_v35, %v276_v15 }
  0x4e   :  { %v316_v27 = vmul.f32 %v717_v3, %v315_v1  ;;  %v387_v5 = vld.sshfl [vmem:[#allocation1 + $0x20] sm:$0xff pattern:$0x75316420]  ;;  %v389_v32 = vld.sshfl [vmem:[#allocation1 + $0x30] sm:$0xff pattern:$0x75316420]  ;;  %v300_v42 = vsel %vm777_vm2, %v713_v37, %v296_v19  ;;  %v270_v23 = vsel %vm753_vm8, %v699_v34, %v266_v33  ;;  %v290_v47 = vsel %vm765_vm14, %v709_v31, %v286_v25 }
  0x4f   :  { %v335_v2 = vsub.f32 1.5, %v334_v56  ;;  %v326_v39 = vmul.f32 %v719_v4, %v325_v13 }
  0x50   :  { %v320_v45 = vsel %vm788_vm5, %v717_v3, %v316_v27  ;;  %v310_v3 = vsel %vm810_vm10, %v715_v38, %v306_v21 }
  0x51   :  { %v336_v17 = vmul.f32 %v721_v58, %v335_v2 }
  0x53   :  { %v340_v35 = vsel %vm801_vm9, %v721_v58, %v336_v17  ;;  %v330_v58 = vsel %vm825_vm12, %v719_v4, %v326_v39 }
  0x7a   :  { %v370_v14 = vpop.permute.xlu0 %369 }
  0x7b   :  { %v400_v6 = vmul.f32 %v380_v26, %v370_v14  ;;  %v402_v40 = vmul.f32 %v382_v9, %v370_v14  ;;  %v404_v43 = vmul.f32 %v388_v29, %v370_v14  ;;  %v406_v44 = vmul.f32 %v390_v20, %v370_v14 }
  0x7c   :  { %v399_v46 = vmul.f32 %v379_v36, %v370_v14  ;;  %v401_v37 = vmul.f32 %v381_v16, %v370_v14  ;;  %v403_v48 = vmul.f32 %v387_v5, %v370_v14  ;;  %v405_v49 = vmul.f32 %v389_v32, %v370_v14 }
  0x7d   :  { %v408_v50 = vmul.f32 %v400_v6, %v280_v41  ;;  %v410_v51 = vmul.f32 %v402_v40, %v300_v42  ;;  %v412_v53 = vmul.f32 %v404_v43, %v320_v45  ;;  %v414_v54 = vmul.f32 %v406_v44, %v340_v35 }
  0x7e   :  { %v407_v34 = vmul.f32 %v399_v46, %v270_v23  ;;  %v409_v55 = vmul.f32 %v401_v37, %v290_v47  ;;  %v411_v31 = vmul.f32 %v403_v48, %v310_v3  ;;  %v413_v59 = vmul.f32 %v405_v49, %v330_v58 }
  0x82   :  { %v418_v52 = vpop.permute.xlu0 %417 }
  0x83   :  { %v421_v56 = vadd.f32 %v418_v52, %v408_v50  ;;  %v423_v57 = vadd.f32 %v418_v52, %v410_v51  ;;  %v425_v60 = vadd.f32 %v418_v52, %v412_v53  ;;  %v427_v61 = vadd.f32 %v418_v52, %v414_v54 }
  0x84   :  { %v420_v62 = vadd.f32 %v418_v52, %v407_v34  ;;  %v422_v63 = vadd.f32 %v418_v52, %v409_v55  ;;  %v424_v1 = vadd.f32 %v418_v52, %v411_v31  ;;  %v426_v2 = vadd.f32 %v418_v52, %v413_v59 }
  0x85   :  { %v436_v38 = vrot.slane %v421_v56, 4  ;;  %v437_v0 = vrot.slane %v423_v57, 4  ;;  %v438_v4 = vrot.slane %v425_v60, 4  ;;  %v439_v8 = vrot.slane %v427_v61, 4 }
  0x87   :  { %v440_v10 = vsel %vm62_vm0, %v420_v62, %v436_v38  ;;  %v441_v7 = vsel %vm62_vm0, %v422_v63, %v437_v0  ;;  %v442_v11 = vsel %vm62_vm0, %v424_v1, %v438_v4  ;;  %v443_v12 = vsel %vm62_vm0, %v426_v2, %v439_v8 }
  0x88   :  { %448 = vst [vmem:[#allocation5] sm:$0xff] %v440_v10 }
  0x89   :  { %449 = vst [vmem:[#allocation5 + $0x8] sm:$0xff] %v441_v7 }
  0x8a   :  { %450 = vst [vmem:[#allocation5 + $0x10] sm:$0xff] %v442_v11 }
  0x8b   :  { %451 = vst [vmem:[#allocation5 + $0x18] sm:$0xff] %v443_v12 }
  0x8c   :  { %464 = dma.vmem_to_hbm [thread:$0]  %s457_s2, 512, %s459_s24, [#allocation4], %s549_s17, %s549_s17, %s550_s18  }
  0x8d   :  { %546 = dma.done.wait [#allocation4], 512  }
  0x8e   :  { %547 = vsyncadd [#allocation4], 4294966784 }
  0x8f   :  { %469 = vsyncpa [#allocation3], 1 }
  0x90   :  { %470 = vsyncpa [#allocation4], 1 }

</bundles_post_ra>
